<compile_context>
chip_gen: v6e
topology: v6e:2x2x1
jax: 0.10.0
libtpu: 0.0.40
codegen_flags: <defaults>
</compile_context>

<pallas_src>
import functools

import jax
import jax.numpy as jnp
from jax import lax
from jax.experimental import pallas as pl
from jax.experimental.pallas import tpu as pltpu


def _round_up(x: int, m: int) -> int:
    return ((x + m - 1) // m) * m


# --------------------------------------------------------------------------
# Fast path: the whole contraction dim fits in one VMEM slab (1-D grid).
# --------------------------------------------------------------------------
def basic_block_fused_kernel(x_ref, w_ref, b_ref, o_ref):
    """x_ref: (TB, NIN_P)  w_ref: (NOUT_P, NIN_P)  b_ref: (1, NOUT_P)
    o_ref: (TB, NOUT_P).  Weight/bias block indices are constant -> resident.
    """
    acc = lax.dot_general(
        x_ref[...], w_ref[...],
        dimension_numbers=(((1,), (1,)), ((), ())),   # x @ w.T, no transpose op
        preferred_element_type=jnp.float32)
    o_ref[...] = jnp.tanh(acc + b_ref[...]).astype(o_ref.dtype)


# --------------------------------------------------------------------------
# General path: K (nin) is tiled; accumulate in f32 VMEM scratch.
# --------------------------------------------------------------------------
def basic_block_acc_kernel(x_ref, w_ref, b_ref, o_ref, acc_ref):
    """x_ref: (TB, TK)  w_ref: (NOUT_P, TK)  b_ref: (1, NOUT_P)
    o_ref: (TB, NOUT_P)  acc_ref: (TB, NOUT_P) f32 scratch (K-resident).
    """
    k = pl.program_id(1)

    @pl.when(k == 0)
    def _():
        acc_ref[...] = jnp.zeros_like(acc_ref)

    acc_ref[...] += lax.dot_general(
        x_ref[...], w_ref[...],
        dimension_numbers=(((1,), (1,)), ((), ())),
        preferred_element_type=jnp.float32)

    @pl.when(k == pl.num_programs(1) - 1)
    def _():
        # Epilogue once per output tile: bias add (VPU) + tanh (EUP).
        o_ref[...] = jnp.tanh(acc_ref[...] + b_ref[...]).astype(o_ref.dtype)


@functools.partial(jax.jit, static_argnames=("tb", "tk"))
def basic_block(x, weight, bias, *, tb=256, tk=512):
    """tanh(x @ weight.T + bias), matching nn.Linear(nin, nout) + F.tanh.

    x:      (..., nin)    arbitrary leading dims (flattened to a batch)
    weight: (nout, nin)   PyTorch nn.Linear layout (no wrapper transpose)
    bias:   (nout,)
    """
    orig_shape = x.shape
    nin = orig_shape[-1]
    nout = weight.shape[0]
    x2 = x.reshape(-1, nin)
    B = x2.shape[0]
    LANE = 128

    # ---- pad to lane-dense / tileable shapes (zeros don't change results) ---
    nout_p = _round_up(nout, LANE)
    nin_p = _round_up(nin, LANE)
    single_k = nin_p <= tk
    if not single_k:
        nin_p = _round_up(nin_p, tk)
        tk_eff = tk
    else:
        tk_eff = nin_p

    tb_eff = min(tb, _round_up(B, 8))        # don't tile past the batch size
    b_p = _round_up(B, tb_eff)

    x_p = x2
    if (b_p, nin_p) != (B, nin):
        x_p = jnp.pad(x2, ((0, b_p - B), (0, nin_p - nin)))
    w_p = weight
    if (nout_p, nin_p) != (nout, nin):
        w_p = jnp.pad(weight, ((0, nout_p - nout), (0, nin_p - nin)))
    bias_p = bias
    if nout_p != nout:
        bias_p = jnp.pad(bias, (0, nout_p - nout))
    bias2 = bias_p.reshape(1, nout_p)        # 2-D for TPU-friendly broadcast

    if single_k:
        # 1-D grid over batch tiles; weight & bias fully VMEM-resident.
        grid = (b_p // tb_eff,)
        out_p = pl.pallas_call(
            basic_block_fused_kernel,
            out_shape=jax.ShapeDtypeStruct((b_p, nout_p), x.dtype),
            grid_spec=pltpu.PrefetchScalarGridSpec(
                num_scalar_prefetch=0,
                grid=grid,
                in_specs=[
                    pl.BlockSpec((tb_eff, nin_p), lambda i: (i, 0)),
                    pl.BlockSpec((nout_p, nin_p), lambda i: (0, 0)),
                    pl.BlockSpec((1, nout_p), lambda i: (0, 0)),
                ],
                out_specs=pl.BlockSpec((tb_eff, nout_p), lambda i: (i, 0)),
            ),
            compiler_params=pltpu.CompilerParams(
                dimension_semantics=("parallel",),
                vmem_limit_bytes=64 << 20,
            ),
        )(x_p, w_p, bias2)
    else:
        # 2-D grid: batch (parallel) x K-reduction (arbitrary, last).
        grid = (b_p // tb_eff, nin_p // tk_eff)
        out_p = pl.pallas_call(
            basic_block_acc_kernel,
            out_shape=jax.ShapeDtypeStruct((b_p, nout_p), x.dtype),
            grid_spec=pltpu.PrefetchScalarGridSpec(
                num_scalar_prefetch=0,
                grid=grid,
                in_specs=[
                    pl.BlockSpec((tb_eff, tk_eff), lambda i, k: (i, k)),
                    pl.BlockSpec((nout_p, tk_eff), lambda i, k: (0, k)),
                    pl.BlockSpec((1, nout_p), lambda i, k: (0, 0)),
                ],
                out_specs=pl.BlockSpec((tb_eff, nout_p), lambda i, k: (i, 0)),
                scratch_shapes=[pltpu.VMEM((tb_eff, nout_p), jnp.float32)],
            ),
            compiler_params=pltpu.CompilerParams(
                dimension_semantics=("parallel", "arbitrary"),
                vmem_limit_bytes=64 << 20,
            ),
        )(x_p, w_p, bias2)

    # Strip padding and restore leading dims.
    out = out_p[:B, :nout]
    return out.reshape(orig_shape[:-1] + (nout,))


if __name__ == "__main__":
    key = jax.random.PRNGKey(0)
    k_x, k_w, k_b = jax.random.split(key, 3)

    B, nin, nout = 8, 32, 32
    x = jax.random.normal(k_x, (B, nin), dtype=jnp.float32)
    # Deterministic synthetic parameters (same shapes as nn.Linear(nin, nout)).
    bound = 1.0 / jnp.sqrt(nin)
    weight = jax.random.uniform(k_w, (nout, nin), minval=-bound, maxval=bound,
                                dtype=jnp.float32)
    bias = jax.random.uniform(k_b, (nout,), minval=-bound, maxval=bound,
                              dtype=jnp.float32)

    out = basic_block(x, weight, bias)
    jax.block_until_ready(out)

    # Cross-check against plain-JAX reference.
    ref = jnp.tanh(x @ weight.T + bias)
    assert out.shape == (B, nout)
    assert jnp.allclose(out, ref, atol=1e-5, rtol=1e-5)
    print("KERNEL_OK")
</pallas_src>

<mosaic_0001>
module attributes {stable_mosaic.version = 11 : i64} {
  func.func @basic_block_fused_kernel(%arg0: i32, %arg1: memref<8x128xf32, #tpu.memory_space<vmem>>, %arg2: memref<128x128xf32, #tpu.memory_space<vmem>>, %arg3: memref<1x128xf32, #tpu.memory_space<vmem>>, %arg4: memref<8x128xf32, #tpu.memory_space<vmem>>) attributes {dimension_semantics = [#tpu.dimension_semantics<parallel>], iteration_bounds = array<i64: 1>, scalar_prefetch = 0 : i64, scratch_operands = 0 : i64, tpu.core_type = #tpu.core_type<tc>, window_params = [{transform_indices = @transform_0, window_bounds = array<i64: 8, 128>}, {pipeline_mode = #tpu.pipeline_mode<synchronous>, transform_indices = @transform_1, window_bounds = array<i64: 128, 128>}, {pipeline_mode = #tpu.pipeline_mode<synchronous>, transform_indices = @transform_2, window_bounds = array<i64: 1, 128>}, {transform_indices = @transform_3, window_bounds = array<i64: 8, 128>}]} {
    %c0 = arith.constant 0 : index
    %c0_0 = arith.constant 0 : index
    %0 = vector.load %arg1[%c0, %c0_0] : memref<8x128xf32, #tpu.memory_space<vmem>>, vector<8x128xf32>
    %c0_1 = arith.constant 0 : index
    %c0_2 = arith.constant 0 : index
    %1 = vector.load %arg2[%c0_1, %c0_2] : memref<128x128xf32, #tpu.memory_space<vmem>>, vector<128x128xf32>
    %cst = arith.constant dense<0.000000e+00> : vector<8x128xf32>
    %2 = tpu.matmul %0, %1, %cst {dimension_numbers = #tpu.dot_dimension_numbers<[1], [1], [0], [0], [0, 0, 1, 0], [], []>} : vector<8x128xf32>, vector<128x128xf32>, vector<8x128xf32> -> vector<8x128xf32>
    %c0_3 = arith.constant 0 : index
    %c0_4 = arith.constant 0 : index
    %3 = vector.load %arg3[%c0_3, %c0_4] : memref<1x128xf32, #tpu.memory_space<vmem>>, vector<1x128xf32>
    %4 = vector.broadcast %3 : vector<1x128xf32> to vector<8x128xf32>
    %5 = arith.addf %2, %4 : vector<8x128xf32>
    %6 = math.tanh %5 : vector<8x128xf32>
    %c0_5 = arith.constant 0 : index
    %c0_6 = arith.constant 0 : index
    %7 = vector.load %arg4[%c0_5, %c0_6] : memref<8x128xf32, #tpu.memory_space<vmem>>, vector<8x128xf32>
    tpu.vector_store %arg4[%c0_5, %c0_6], %6 {strides = array<i32>} : memref<8x128xf32, #tpu.memory_space<vmem>>, vector<8x128xf32>,
    return
  }
  func.func @transform_0(%arg0: i32) -> (i32, i32) {
    %c0_i32 = arith.constant 0 : i32
    %c0_i32_0 = arith.constant 0 : i32
    return %arg0, %c0_i32 : i32, i32
  }
  func.func @transform_1(%arg0: i32) -> (i32, i32) {
    %c0_i32 = arith.constant 0 : i32
    %c0_i32_0 = arith.constant 0 : i32
    %c0_i32_1 = arith.constant 0 : i32
    return %c0_i32, %c0_i32_0 : i32, i32
  }
  func.func @transform_2(%arg0: i32) -> (i32, i32) {
    %c0_i32 = arith.constant 0 : i32
    %c0_i32_0 = arith.constant 0 : i32
    %c0_i32_1 = arith.constant 0 : i32
    return %c0_i32, %c0_i32_0 : i32, i32
  }
  func.func @transform_3(%arg0: i32) -> (i32, i32) {
    %c0_i32 = arith.constant 0 : i32
    %c0_i32_0 = arith.constant 0 : i32
    return %arg0, %c0_i32 : i32, i32
  }
}

</mosaic_0001>

<bundles_post_ra>
// kernel: basic_block.1
= control target key start
LH: loop header
LB: loop body
LE: loop exit
PB: predicated region body
PF: predicated region fallthrough
CT: control target
= control target key end

     0   :  { %v205_v1 = vmov 0.0   ;;  %vm206_vm0 = vmmov 0   ;;  %s285_s0 = inlined_call_operand.vmem [shape: f32[8,128], index: 0, kind: input, shape index: {}]   ;;  %s286_s1 = inlined_call_operand.vmem [shape: f32[128,128], index: 1, kind: input, shape index: {}]   ;;  %s287_s2 = inlined_call_operand.vmem [shape: f32[1,128], index: 2, kind: input, shape index: {}]   ;;  %s288_s3 = inlined_call_operand.hbm [shape: f32[8,128], index: 3, kind: output, shape index: {}]  }
   0x1   :  { %v31_v0 = vld [vmem:[%s286_s1 + $0x78] sm:$0xff]  ;;  %143 = vmatprep.subr.mxu0 %v205_v1  ;;  %175 = vmatprep.mubr.msk.f32.mxu0 %vm206_vm0, %v205_v1  ;;  %v30_v2 = vld [vmem:[%s286_s1 + $0x70] sm:$0xff] }
   0x2   :  { %144 = vmatpush3.xpose.msra.mxu0 %v31_v0 }
   0x3   :  { %145 = vmatprep.subr.mxu0 %v205_v1 }
   0x6   :  { %146 = vmatpush3.xpose.msra.mxu0 %v30_v2 }
   0x7   :  { %8 = vsyncpa [#allocation3], 0  ;;  %147 = vmatprep.subr.mxu0 %v205_v1  ;;  %v29_v3 = vld [vmem:[%s286_s1 + $0x68] sm:$0xff]  ;;  %v28_v4 = vld [vmem:[%s286_s1 + $0x60] sm:$0xff]  ;;  %s207_s21 = smov [#allocation2]  }
   0x8   :  { %v27_v5 = vld [vmem:[%s286_s1 + $0x58] sm:$0xff]  ;;  %v26_v6 = vld [vmem:[%s286_s1 + $0x50] sm:$0xff]  ;;  %v25_v7 = vld [vmem:[%s286_s1 + $0x48] sm:$0xff]  ;;  %s117_s22 = sshll.u32 %s207_s21, 4  ;;  %s118_s22 = int_to_ptr.vmem [resolvable:$true] %s117_s22 }
   0x9   :  { %v24_v8 = vld [vmem:[%s286_s1 + $0x40] sm:$0xff]  ;;  %v23_v9 = vld [vmem:[%s286_s1 + $0x38] sm:$0xff]  ;;  %v22_v10 = vld [vmem:[%s286_s1 + $0x30] sm:$0xff]  ;;  %p188_p1 = scmp.lt.s32.totalorder %s118_s22, %s118_s22 }
   0xa   :  { %148 = vmatpush3.xpose.msra.mxu0 %v29_v3  ;;  %v21_v11 = vld [vmem:[%s286_s1 + $0x28] sm:$0xff]  ;;  %v20_v12 = vld [vmem:[%s286_s1 + $0x20] sm:$0xff]  ;;  %v19_v13 = vld [vmem:[%s286_s1 + $0x18] sm:$0xff] }
   0xb   :  { %149 = vmatprep.subr.mxu0 %v205_v1  ;;  %v18_v14 = vld [vmem:[%s286_s1 + $0x10] sm:$0xff]  ;;  %v17_v15 = vld [vmem:[%s286_s1 + $0x8] sm:$0xff]  ;;  %v16_v16 = vld [vmem:[%s286_s1] sm:$0xff]  ;;  %s183_s1 = scalar_lea.vmem %s118_s22, 128 }
   0xc   :  { %v15_v17 = vld [vmem:[%s285_s0] sm:$0xff]  ;;  %p184_p0 = scmp.ne.s32.totalorder %s118_s22, %s183_s1  ;;  %p189_p2 = scmp.lt.s32.totalorder %s183_s1, %s183_s1 }
   0xd   :  { %v125_v18 = vld [vmem:[%s287_s2] ss:$0 sm:$0xff] }
   0xe   :  { %150 = vmatpush3.xpose.msra.mxu0 %v28_v4  ;;  %p190_p3 = por %p189_p2, %p188_p1 }
   0xf   :  { %151 = vmatprep.subr.mxu0 %v205_v1 }
  0x10   :  { %p191_p4 = pnand %p190_p3, %p184_p0 }
  0x12   :  { %152 = vmatpush3.xpose.msra.mxu0 %v27_v5 }
  0x13   :  { %153 = vmatprep.subr.mxu0 %v205_v1 }
  0x16   :  { %154 = vmatpush3.xpose.msra.mxu0 %v26_v6 }
  0x17   :  { %155 = vmatprep.subr.mxu0 %v205_v1 }
  0x1a   :  { %156 = vmatpush3.xpose.msra.mxu0 %v25_v7 }
  0x1b   :  { %157 = vmatprep.subr.mxu0 %v205_v1 }
  0x1e   :  { %158 = vmatpush3.xpose.msra.mxu0 %v24_v8 }
  0x1f   :  { %159 = vmatprep.subr.mxu0 %v205_v1 }
  0x22   :  { %160 = vmatpush3.xpose.msra.mxu0 %v23_v9 }
  0x23   :  { %161 = vmatprep.subr.mxu0 %v205_v1 }
  0x26   :  { %162 = vmatpush3.xpose.msra.mxu0 %v22_v10 }
  0x27   :  { %163 = vmatprep.subr.mxu0 %v205_v1 }
  0x2a   :  { %164 = vmatpush3.xpose.msra.mxu0 %v21_v11 }
  0x2b   :  { %165 = vmatprep.subr.mxu0 %v205_v1 }
  0x2e   :  { %166 = vmatpush3.xpose.msra.mxu0 %v20_v12 }
  0x2f   :  { %167 = vmatprep.subr.mxu0 %v205_v1 }
  0x32   :  { %168 = vmatpush3.xpose.msra.mxu0 %v19_v13 }
  0x33   :  { %169 = vmatprep.subr.mxu0 %v205_v1 }
  0x36   :  { %170 = vmatpush3.xpose.msra.mxu0 %v18_v14 }
  0x37   :  { %171 = vmatprep.subr.mxu0 %v205_v1 }
  0x3a   :  { %172 = vmatpush3.xpose.msra.mxu0 %v17_v15 }
  0x3b   :  { %173 = vmatprep.subr.mxu0 %v205_v1 }
  0x3e   :  { %174 = vmatpush3.xpose.msra.mxu0 %v16_v16 }
  0x41   :  { %176 = vmatmul.mubr.f32.vlgmr.msra.gmra.mxu0 %v15_v17 }
 0x101   :  { %v105_v19 = vpop.f32.mrf.mxu0 }
 0x102   :  { %v106_v20 = vadd.f32 %v125_v18, %v105_v19 }
 0x103   :  { %v177_v21 = vpop.f32.mrf.mxu0 }
 0x104   :  { %181 = vtanh.f32 %v106_v20 }
 0x111   :  { %v182_v22 = vpop.eup %181 }
 0x112   :  { %110 = vst [vmem:[#allocation2] sm:$0xff] %v182_v22 }
 0x113   :  { %194 = shalt.err (!%p191_p4)
}
 0x114   :  { %120 = dma.vmem_to_hbm [thread:$0]  %s118_s22, 128, %s288_s3, [#allocation3]  }
 0x115   :  { %203 = dma.done.wait [#allocation3], 128  }
 0x116   :  { %204 = vsyncadd [#allocation3], 4294967168 }
 0x117   :  { %124 = vsyncpa [#allocation3], 1 }

</bundles_post_ra>
